<compile_context>
chip_gen: v6e
topology: v6e:2x2x1
jax: 0.10.0
libtpu: 0.0.40
codegen_flags: <defaults>
</compile_context>

<pallas_src>
import functools
import math

import jax
import jax.numpy as jnp
from jax.experimental import pallas as pl
from jax.experimental.pallas import tpu as pltpu


# MXU operand dtype: bf16 halves HBM/VMEM traffic; accumulation stays f32 via
# preferred_element_type.
MATMUL_DTYPE = jnp.bfloat16
# Max rows (B*D) per grid step (multiple of 8 sublanes).
TILE_ROWS = 512
# Column-chunk width of the folded per-level map (multiple of 128 lanes);
# bounds the f32 intermediate to TILE_ROWS*FCHUNK*4 bytes per level.
FCHUNK = 2048

_ACTS = {"gelu": jax.nn.gelu, "relu": jax.nn.relu, "tanh": jnp.tanh}


def _detect_kind():
    try:
        return jax.devices()[0].device_kind.lower()
    except Exception:  # pragma: no cover - CPU / uninitialized backend
        return ""


_KIND = _detect_kind()
# bf16 VPU/EUP exists on v6e/v7x; keep f32 elementwise on older gens.
_ELEM_DTYPE = jnp.bfloat16 if ("v6" in _KIND or "v7" in _KIND) else jnp.float32
# Scoped-VMEM limit: default is only 16/32 MiB; raise it (but stay under v7x's
# 64 MiB physical VMEM).
_VMEM_LIMIT = (56 << 20) if "v7" in _KIND else (100 << 20)


def _round_up(n, m):
    return ((n + m - 1) // m) * m


# ----------------------------------------------------------------------------
# Pallas kernels
# ----------------------------------------------------------------------------
def _level_repr(x_lvl, m_ref, c_ref, w2_ref, f, fchunk, elem_dt):
    """repr = gelu(x_lvl @ M + const) @ W2, F-chunked with f32 accumulator.

    x_lvl: (tr, lp) value; m_ref: (lp, f); c_ref: (1, f); w2_ref: (f, rpad).
    The chunking keeps the f32 `h` intermediate at (tr, fchunk) regardless of
    how large lp*d_model gets.
    """
    tr = x_lvl.shape[0]
    rpad = w2_ref.shape[1]
    acc = jnp.zeros((tr, rpad), jnp.float32)
    for c0 in range(0, f, fchunk):
        c1 = min(c0 + fchunk, f)
        pre = jnp.dot(x_lvl, m_ref[:, c0:c1], preferred_element_type=jnp.float32)
        h = jax.nn.gelu((pre + c_ref[:, c0:c1]).astype(elem_dt))
        acc = acc + jnp.dot(h.astype(MATMUL_DTYPE), w2_ref[c0:c1, :],
                            preferred_element_type=jnp.float32)
    return acc


def _levels_kernel(level_meta, llab, rpad, fchunk, elem_dt, x_ref, *refs):
    """First stage: all pyramid levels fused; each level's (tr, rpad) result is
    stored straight into its 128-aligned lane slice of the output."""
    o_ref = refs[-1]
    wrefs = refs[:-1]
    x = x_ref[...]                                   # (tr, llab) bf16
    for py, (lp, f) in enumerate(level_meta):
        m_ref, c_ref, w2_ref, b_ref = wrefs[4 * py: 4 * py + 4]
        x_lvl = x[:, llab - lp:]                     # static lane slice
        r = _level_repr(x_lvl, m_ref, c_ref, w2_ref, f, fchunk, elem_dt)
        r = r + b_ref[...]
        o_ref[:, py * rpad:(py + 1) * rpad] = r.astype(o_ref.dtype)


def _second_kernel(level_meta, llab, rpad, fchunk, elem_dt, act_fn,
                   x_ref, *refs):
    """Second stage, fully fused: pyramid levels + FC block.

    concat(reprs) @ W1 is computed as an accumulation of per-level partial
    matmuls, so the concatenated representation never exists (neither in HBM
    nor as one big vreg value)."""
    o_ref = refs[-1]
    w1_ref, b1_ref, w2m_ref, b2_ref = refs[-5:-1]
    x = x_ref[...]
    tr = x.shape[0]
    hidden = w1_ref.shape[1]
    acc1 = jnp.zeros((tr, hidden), jnp.float32)
    for py, (lp, f) in enumerate(level_meta):
        m_ref, c_ref, w2_ref, b_ref = refs[4 * py: 4 * py + 4]
        x_lvl = x[:, llab - lp:]
        r = _level_repr(x_lvl, m_ref, c_ref, w2_ref, f, fchunk, elem_dt)
        r = r + b_ref[...]
        # padded repr lanes are exactly zero and the matching W1 rows are zero,
        # so the padded contraction equals the unpadded one.
        acc1 = acc1 + jnp.dot(r.astype(MATMUL_DTYPE),
                              w1_ref[py * rpad:(py + 1) * rpad, :],
                              preferred_element_type=jnp.float32)
    h1 = act_fn((acc1 + b1_ref[...]).astype(elem_dt))
    y = jnp.dot(h1.astype(MATMUL_DTYPE), w2m_ref[...],
                preferred_element_type=jnp.float32)
    o_ref[...] = (y + b2_ref[...]).astype(o_ref.dtype)


# ----------------------------------------------------------------------------
# Pallas wrappers (row-tiled, row-parallel grid)
# ----------------------------------------------------------------------------
def _row_tiling(n_rows, tile_rows=TILE_ROWS):
    """Adaptive row tiling: tr multiple of 8, >=2 grid steps when possible
    (v7x megacore), padding waste bounded by <8 rows per grid step."""
    rows8 = _round_up(max(n_rows, 8), 8)
    grid = max(pl.cdiv(rows8, tile_rows), 2 if rows8 >= 16 else 1)
    tr = _round_up(pl.cdiv(rows8, grid), 8)
    rows = tr * grid
    return rows, tr, grid


def _pad_rows(x, rows):
    return x if rows == x.shape[0] else jnp.pad(x, ((0, rows - x.shape[0]), (0, 0)))


def _invariant_spec(shape):
    """Grid-invariant (weight) operand: constant index_map, single-buffered."""
    return pl.BlockSpec(shape, lambda i: (0, 0), pipeline_mode=pl.Buffered(1))


def pallas_a2a_first(x_lab, folded_levels, level_meta, llab, rpad,
                     *, tile_rows=TILE_ROWS):
    """All pyramid levels in ONE pallas_call.  Returns (BD, pyramid*rpad) f32;
    level py's representation lives in lanes [py*rpad, py*rpad+repr_dim)."""
    n_rows = x_lab.shape[0]
    pyramid = len(folded_levels)
    n_out = pyramid * rpad
    rows, tr, grid = _row_tiling(n_rows, tile_rows)
    xp = _pad_rows(x_lab, rows).astype(MATMUL_DTYPE)

    args = [xp]
    in_specs = [pl.BlockSpec((tr, llab), lambda i: (i, 0))]
    for lvl in folded_levels:
        for name in ("m", "c", "w2", "b"):
            args.append(lvl[name])
            in_specs.append(_invariant_spec(lvl[name].shape))

    out = pl.pallas_call(
        functools.partial(_levels_kernel, tuple(level_meta), llab, rpad,
                          FCHUNK, _ELEM_DTYPE),
        out_shape=jax.ShapeDtypeStruct((rows, n_out), jnp.float32),
        grid=(grid,),
        in_specs=in_specs,
        out_specs=pl.BlockSpec((tr, n_out), lambda i: (i, 0)),
        compiler_params=pltpu.CompilerParams(
            dimension_semantics=("parallel",),       # megacore-shardable rows
            vmem_limit_bytes=_VMEM_LIMIT),
    )(*args)
    return out[:n_rows]


def pallas_a2a_second(x_lab, folded_levels, level_meta, mlp, llab, rpad,
                      act_fn, *, tile_rows=TILE_ROWS):
    """Fully fused second stage: levels + FC block, one pallas_call.
    Returns (BD, pred_pad) f32 (prediction in the first `pred` lanes)."""
    n_rows = x_lab.shape[0]
    pred_pad = mlp["w2"].shape[1]
    rows, tr, grid = _row_tiling(n_rows, tile_rows)
    xp = _pad_rows(x_lab, rows).astype(MATMUL_DTYPE)

    args = [xp]
    in_specs = [pl.BlockSpec((tr, llab), lambda i: (i, 0))]
    for lvl in folded_levels:
        for name in ("m", "c", "w2", "b"):
            args.append(lvl[name])
            in_specs.append(_invariant_spec(lvl[name].shape))
    for name in ("w1", "b1", "w2", "b2"):
        args.append(mlp[name])
        in_specs.append(_invariant_spec(mlp[name].shape))

    out = pl.pallas_call(
        functools.partial(_second_kernel, tuple(level_meta), llab, rpad,
                          FCHUNK, _ELEM_DTYPE, act_fn),
        out_shape=jax.ShapeDtypeStruct((rows, pred_pad), jnp.float32),
        grid=(grid,),
        in_specs=in_specs,
        out_specs=pl.BlockSpec((tr, pred_pad), lambda i: (i, 0)),
        compiler_params=pltpu.CompilerParams(
            dimension_semantics=("parallel",),
            vmem_limit_bytes=_VMEM_LIMIT),
    )(*args)
    return out[:n_rows]


# ----------------------------------------------------------------------------
# plain-JAX parameter folding (runs ONCE at param-load time, outside jit)
# ----------------------------------------------------------------------------
def sinusoidal_pe(length, d_model):
    pos = jnp.arange(length, dtype=jnp.float32)[:, None]
    div = jnp.exp(jnp.arange(0, d_model, 2, dtype=jnp.float32)
                  * (-math.log(10000.0) / d_model))
    pe = jnp.zeros((length, d_model), jnp.float32)
    pe = pe.at[:, 0::2].set(jnp.sin(pos * div))
    pe = pe.at[:, 1::2].set(jnp.cos(pos * div))
    return pe


def _fold_embed_conv(embed_w, embed_b, pe, conv_w, conv_b, lp, d_model, k):
    """Fold circular embed conv + PE + bias + zero-pad ELAN conv into one
    affine map: pre_flat = xs @ M + const with flat index t*d_model + c'."""
    f32 = jnp.float32
    pad_e = k // 2
    pad_c = k // 2
    t = jnp.arange(lp)
    j = jnp.arange(k)

    # circular value-embedding as linear map A[s, u, c]: xs[s] -> emb[u, c]
    src_e = (t[:, None] + j[None, :] - pad_e) % lp                    # (u, j)
    sel_e = (jnp.arange(lp)[:, None, None] == src_e[None, :, :]).astype(f32)
    a_map = jnp.einsum('suj,jc->suc', sel_e, embed_w)                 # (s, u, c)
    emb_const = pe + embed_b[None, :]                                 # (u, c)

    # zero-'same'-pad conv as linear map over emb: emb[u, c] -> pre[t, c']
    pos = t[:, None] + j[None, :] - pad_c                             # (t, j2)
    valid = ((pos >= 0) & (pos < lp)).astype(f32)
    pos_c = jnp.clip(pos, 0, lp - 1)
    sel_c = (jnp.arange(lp)[:, None, None] == pos_c[None, :, :]).astype(f32) \
        * valid[None, :, :]                                           # (u, t, j2)

    m = jnp.einsum('suc,utj,jcd->std', a_map, sel_c, conv_w)          # (s, t, c')
    const = jnp.einsum('uc,utj,jcd->td', emb_const, sel_c, conv_w) \
        + conv_b[None, :]                                             # (t, c')
    return m.reshape(lp, lp * d_model), const.reshape(lp * d_model)


def _fold_pool_repr(repr_w, lp, d_model, factor, lout, repr_dim):
    """Fold AvgPool1d(factor) over time + channel-major flatten + repr Linear
    into one (lp*d_model, repr_dim) matrix (tail samples dropped like PyTorch).
    TODO(synk): verify against upstream when lp is not divisible by factor."""
    t = jnp.arange(lp)
    to = jnp.minimum(t // factor, lout - 1)
    valid = (t < lout * factor).astype(jnp.float32)
    cp = jnp.arange(d_model)
    idx = cp[None, :] * lout + to[:, None]                            # (t, c')
    w = repr_w[idx] * (valid[:, None, None] / factor)                 # (t, c', r)
    return w.reshape(lp * d_model, repr_dim)


def fold_params(params, cfg):
    """Fold raw parameters into the per-level / per-MLP operands the kernels
    consume.  Pure, eager, executed once; its outputs are plain device arrays
    that are streamed into the kernels on every forward."""
    d_model, repr_dim, k = cfg["d_model"], cfg["repr_dim"], cfg["kernel"]
    llab = cfg["label_len"]
    pyramid = cfg["pyramid"]
    rpad = _round_up(repr_dim, 128)       # lane-dense per-level output width

    levels = []
    for py in range(pyramid):
        p = params["levels"][py]
        lp = llab // 2 ** py
        factor = cfg["attn_nums"] - py + 1
        lout = lp // factor
        f = lp * d_model
        m, const = _fold_embed_conv(p["embed_w"], p["embed_b"], p["pe"],
                                    p["conv_w"], p["conv_b"], lp, d_model, k)
        w2 = _fold_pool_repr(p["repr_w"], lp, d_model, factor, lout, repr_dim)
        w2p = jnp.zeros((f, rpad), jnp.float32).at[:, :repr_dim].set(w2)
        bp = jnp.zeros((rpad,), jnp.float32).at[:repr_dim].set(p["repr_b"])
        levels.append(dict(
            m=m.astype(MATMUL_DTYPE),                       # (lp, f)
            c=const.reshape(1, f).astype(jnp.float32),      # (1, f)
            w2=w2p.astype(MATMUL_DTYPE),                    # (f, rpad)
            b=bp.reshape(1, rpad).astype(jnp.float32)))     # (1, rpad)

    mlps = []
    hidden = repr_dim
    for mp, pred in zip(params["mlp"], cfg["pred_list"]):
        pred_pad = _round_up(pred, 128)
        # Re-index W1 rows onto the padded per-level lane layout (pad rows = 0).
        w1p = jnp.zeros((pyramid * rpad, hidden), jnp.float32)
        for py in range(pyramid):
            w1p = w1p.at[py * rpad: py * rpad + repr_dim].set(
                mp["w1"][py * repr_dim:(py + 1) * repr_dim])
        w2p = jnp.zeros((hidden, pred_pad), jnp.float32).at[:, :pred].set(mp["w2"])
        b2p = jnp.zeros((pred_pad,), jnp.float32).at[:pred].set(mp["b2"])
        mlps.append(dict(
            w1=w1p.astype(MATMUL_DTYPE),
            b1=mp["b1"].reshape(1, hidden).astype(jnp.float32),
            w2=w2p.astype(MATMUL_DTYPE),
            b2=b2p.reshape(1, pred_pad).astype(jnp.float32)))
    return dict(levels=levels, mlp=mlps)


# ----------------------------------------------------------------------------
# parameters (deterministic synthetic init; shapes follow A2A.__init__)
# ----------------------------------------------------------------------------
def init_params(key, cfg):
    d_model, repr_dim, k = cfg["d_model"], cfg["repr_dim"], cfg["kernel"]
    levels = []
    for py in range(cfg["pyramid"]):
        lp = cfg["label_len"] // 2 ** py
        in_ch = d_model * cfg["label_len"] // 2 ** py // (cfg["attn_nums"] - py + 1)
        key, k1, k2, k3 = jax.random.split(key, 4)
        levels.append(dict(
            embed_w=jax.random.normal(k1, (k, d_model), jnp.float32) / math.sqrt(k),
            embed_b=jnp.zeros((d_model,), jnp.float32),
            conv_w=jax.random.normal(k2, (k, d_model, d_model), jnp.float32)
                   / math.sqrt(k * d_model),
            conv_b=jnp.zeros((d_model,), jnp.float32),
            repr_w=jax.random.normal(k3, (in_ch, repr_dim), jnp.float32)
                   / math.sqrt(in_ch),
            repr_b=jnp.zeros((repr_dim,), jnp.float32),
            pe=sinusoidal_pe(lp, d_model),
        ))
    mlps = []
    in_dim = repr_dim * cfg["pyramid"]
    for pred in cfg["pred_list"]:
        key, k1, k2 = jax.random.split(key, 3)
        mlps.append(dict(
            w1=jax.random.normal(k1, (in_dim, repr_dim), jnp.float32) / math.sqrt(in_dim),
            b1=jnp.zeros((repr_dim,), jnp.float32),
            w2=jax.random.normal(k2, (repr_dim, pred), jnp.float32) / math.sqrt(repr_dim),
            b2=jnp.zeros((pred,), jnp.float32),
        ))
    return dict(levels=levels, mlp=mlps)


# ----------------------------------------------------------------------------
# A2A forward (inference; dropout is identity in eval mode)
# ----------------------------------------------------------------------------
def a2a_forward(folded, x_enc, flag="first stage", index=0, *, cfg):
    B, L, D = x_enc.shape
    d_model, repr_dim = cfg["d_model"], cfg["repr_dim"]
    llab = cfg["label_len"]
    pyramid = cfg["pyramid"]
    rpad = _round_up(repr_dim, 128)
    act_fn = _ACTS[cfg["act"]]

    # (B, L, D) -> (B*D, L); only the last label_len steps are ever used.
    x = jnp.transpose(x_enc, (0, 2, 1)).reshape(B * D, L)[:, L - llab:]
    level_meta = [(llab // 2 ** py, (llab // 2 ** py) * d_model)
                  for py in range(pyramid)]

    if flag == "first stage":
        reprs = pallas_a2a_first(x, folded["levels"], level_meta, llab, rpad)
        return [reprs[:, py * rpad: py * rpad + repr_dim].reshape(B, D, repr_dim)
                for py in range(pyramid)]

    # second stage: levels + FC_block fused in one kernel (no HBM round trip).
    mlp = folded["mlp"][index]
    pred = cfg["pred_list"][index]
    out = pallas_a2a_second(x, folded["levels"], level_meta, mlp, llab, rpad,
                            act_fn)
    temp_out = out[:, :pred].reshape(B, D, pred)
    return jnp.transpose(temp_out, (0, 2, 1))                 # (B, pred, D)


# ----------------------------------------------------------------------------
if __name__ == "__main__":
    cfg = dict(label_len=8, pred_list=[4], enc_in=4, d_model=16, repr_dim=32,
               act="gelu", dropout=0.1, kernel=3, attn_nums=1, pyramid=2)
    B, L, D = 2, 16, cfg["enc_in"]

    key = jax.random.PRNGKey(0)
    kx, kp = jax.random.split(key)
    x_enc = jax.random.normal(kx, (B, L, D), jnp.float32)
    params = init_params(kp, cfg)

    # Fold once, outside jit (the folding einsums never re-run per forward).
    folded = fold_params(params, cfg)

    @jax.jit
    def fwd_first(fp, x):
        return a2a_forward(fp, x, "first stage", 0, cfg=cfg)

    @jax.jit
    def fwd_second(fp, x):
        return a2a_forward(fp, x, "second stage", 0, cfg=cfg)

    # first stage: list of pyramid representations, each (B, D, repr_dim)
    outs_first = fwd_first(folded, x_enc)
    # second stage: prediction head, (B, pred_len, D)
    out_second = fwd_second(folded, x_enc)

    jax.block_until_ready(outs_first)
    out_second = jax.block_until_ready(out_second)

    assert len(outs_first) == cfg["pyramid"]
    assert all(o.shape == (B, D, cfg["repr_dim"]) for o in outs_first)
    assert out_second.shape == (B, cfg["pred_list"][0], D)
    print("KERNEL_OK")
</pallas_src>

<mosaic_0001>
module attributes {stable_mosaic.version = 11 : i64} {
  func.func @_levels_kernel(%arg0: i32, %arg1: memref<8x8xbf16, #tpu.memory_space<vmem>>, %arg2: memref<8x128xbf16, #tpu.memory_space<vmem>>, %arg3: memref<1x128xf32, #tpu.memory_space<vmem>>, %arg4: memref<128x128xbf16, #tpu.memory_space<vmem>>, %arg5: memref<1x128xf32, #tpu.memory_space<vmem>>, %arg6: memref<4x64xbf16, #tpu.memory_space<vmem>>, %arg7: memref<1x64xf32, #tpu.memory_space<vmem>>, %arg8: memref<64x128xbf16, #tpu.memory_space<vmem>>, %arg9: memref<1x128xf32, #tpu.memory_space<vmem>>, %arg10: memref<8x256xf32, #tpu.memory_space<vmem>>) attributes {dimension_semantics = [#tpu.dimension_semantics<parallel>], iteration_bounds = array<i64: 1>, scalar_prefetch = 0 : i64, scratch_operands = 0 : i64, tpu.core_type = #tpu.core_type<tc>, window_params = [{transform_indices = @transform_0, window_bounds = array<i64: 8, 8>}, {pipeline_mode = #tpu.pipeline_mode<synchronous>, transform_indices = @transform_1, window_bounds = array<i64: 8, 128>}, {pipeline_mode = #tpu.pipeline_mode<synchronous>, transform_indices = @transform_2, window_bounds = array<i64: 1, 128>}, {pipeline_mode = #tpu.pipeline_mode<synchronous>, transform_indices = @transform_3, window_bounds = array<i64: 128, 128>}, {pipeline_mode = #tpu.pipeline_mode<synchronous>, transform_indices = @transform_4, window_bounds = array<i64: 1, 128>}, {pipeline_mode = #tpu.pipeline_mode<synchronous>, transform_indices = @transform_5, window_bounds = array<i64: 4, 64>}, {pipeline_mode = #tpu.pipeline_mode<synchronous>, transform_indices = @transform_6, window_bounds = array<i64: 1, 64>}, {pipeline_mode = #tpu.pipeline_mode<synchronous>, transform_indices = @transform_7, window_bounds = array<i64: 64, 128>}, {pipeline_mode = #tpu.pipeline_mode<synchronous>, transform_indices = @transform_8, window_bounds = array<i64: 1, 128>}, {transform_indices = @transform_9, window_bounds = array<i64: 8, 256>}]} {
    %c0 = arith.constant 0 : index
    %c0_0 = arith.constant 0 : index
    %0 = vector.load %arg1[%c0, %c0_0] : memref<8x8xbf16, #tpu.memory_space<vmem>>, vector<8x8xbf16>
    %cst = arith.constant 0.000000e+00 : f32
    %1 = vector.broadcast %cst : f32 to vector<8x128xf32>
    %c0_1 = arith.constant 0 : index
    %c0_2 = arith.constant 0 : index
    %2 = vector.load %arg2[%c0_1, %c0_2] : memref<8x128xbf16, #tpu.memory_space<vmem>>, vector<8x128xbf16>
    %cst_3 = arith.constant dense<0.000000e+00> : vector<8x128xf32>
    %3 = tpu.matmul %0, %2, %cst_3 {dimension_numbers = #tpu.dot_dimension_numbers<[1], [0], [0], [1], [0, 0, 1, 1], [], []>} : vector<8x8xbf16>, vector<8x128xbf16>, vector<8x128xf32> -> vector<8x128xf32>
    %c0_4 = arith.constant 0 : index
    %c0_5 = arith.constant 0 : index
    %4 = vector.load %arg3[%c0_4, %c0_5] : memref<1x128xf32, #tpu.memory_space<vmem>>, vector<1x128xf32>
    %5 = vector.broadcast %4 : vector<1x128xf32> to vector<8x128xf32>
    %6 = arith.addf %3, %5 : vector<8x128xf32>
    %7 = arith.mulf %6, %6 : vector<8x128xf32>
    %8 = arith.mulf %6, %7 : vector<8x128xf32>
    %cst_6 = arith.constant 4.471500e-02 : f32
    %9 = vector.broadcast %cst_6 : f32 to vector<8x128xf32>
    %10 = arith.mulf %9, %8 : vector<8x128xf32>
    %11 = arith.addf %6, %10 : vector<8x128xf32>
    %cst_7 = arith.constant 0.797884583 : f32
    %12 = vector.broadcast %cst_7 : f32 to vector<8x128xf32>
    %13 = arith.mulf %12, %11 : vector<8x128xf32>
    %14 = math.tanh %13 : vector<8x128xf32>
    %cst_8 = arith.constant 1.000000e+00 : f32
    %15 = vector.broadcast %cst_8 : f32 to vector<8x128xf32>
    %16 = arith.addf %15, %14 : vector<8x128xf32>
    %cst_9 = arith.constant 5.000000e-01 : f32
    %17 = vector.broadcast %cst_9 : f32 to vector<8x128xf32>
    %18 = arith.mulf %17, %16 : vector<8x128xf32>
    %19 = arith.mulf %6, %18 : vector<8x128xf32>
    %20 = arith.truncf %19 : vector<8x128xf32> to vector<8x128xbf16>
    %c0_10 = arith.constant 0 : index
    %c0_11 = arith.constant 0 : index
    %21 = vector.load %arg4[%c0_10, %c0_11] : memref<128x128xbf16, #tpu.memory_space<vmem>>, vector<128x128xbf16>
    %cst_12 = arith.constant dense<0.000000e+00> : vector<8x128xf32>
    %22 = tpu.matmul %20, %21, %cst_12 {dimension_numbers = #tpu.dot_dimension_numbers<[1], [0], [0], [1], [0, 0, 1, 1], [], []>} : vector<8x128xbf16>, vector<128x128xbf16>, vector<8x128xf32> -> vector<8x128xf32>
    %23 = arith.addf %1, %22 : vector<8x128xf32>
    %c0_13 = arith.constant 0 : index
    %c0_14 = arith.constant 0 : index
    %24 = vector.load %arg5[%c0_13, %c0_14] : memref<1x128xf32, #tpu.memory_space<vmem>>, vector<1x128xf32>
    %25 = vector.broadcast %24 : vector<1x128xf32> to vector<8x128xf32>
    %26 = arith.addf %23, %25 : vector<8x128xf32>
    %c0_15 = arith.constant 0 : index
    %c0_16 = arith.constant 0 : index
    %27 = vector.load %arg10[%c0_15, %c0_16] : memref<8x256xf32, #tpu.memory_space<vmem>>, vector<8x128xf32>
    tpu.vector_store %arg10[%c0_15, %c0_16], %26 {strides = array<i32>} : memref<8x256xf32, #tpu.memory_space<vmem>>, vector<8x128xf32>,
    %28 = vector.extract_strided_slice %0 {offsets = [0, 4], sizes = [8, 4], strides = [1, 1]} : vector<8x8xbf16> to vector<8x4xbf16>
    %cst_17 = arith.constant 0.000000e+00 : f32
    %29 = vector.broadcast %cst_17 : f32 to vector<8x128xf32>
    %c0_18 = arith.constant 0 : index
    %c0_19 = arith.constant 0 : index
    %30 = vector.load %arg6[%c0_18, %c0_19] : memref<4x64xbf16, #tpu.memory_space<vmem>>, vector<4x64xbf16>
    %cst_20 = arith.constant dense<0.000000e+00> : vector<8x64xf32>
    %31 = tpu.matmul %28, %30, %cst_20 {dimension_numbers = #tpu.dot_dimension_numbers<[1], [0], [0], [1], [0, 0, 1, 1], [], []>} : vector<8x4xbf16>, vector<4x64xbf16>, vector<8x64xf32> -> vector<8x64xf32>
    %c0_21 = arith.constant 0 : index
    %c0_22 = arith.constant 0 : index
    %32 = vector.load %arg7[%c0_21, %c0_22] : memref<1x64xf32, #tpu.memory_space<vmem>>, vector<1x64xf32>
    %33 = vector.broadcast %32 : vector<1x64xf32> to vector<8x64xf32>
    %34 = arith.addf %31, %33 : vector<8x64xf32>
    %35 = arith.mulf %34, %34 : vector<8x64xf32>
    %36 = arith.mulf %34, %35 : vector<8x64xf32>
    %cst_23 = arith.constant 4.471500e-02 : f32
    %37 = vector.broadcast %cst_23 : f32 to vector<8x64xf32>
    %38 = arith.mulf %37, %36 : vector<8x64xf32>
    %39 = arith.addf %34, %38 : vector<8x64xf32>
    %cst_24 = arith.constant 0.797884583 : f32
    %40 = vector.broadcast %cst_24 : f32 to vector<8x64xf32>
    %41 = arith.mulf %40, %39 : vector<8x64xf32>
    %42 = math.tanh %41 : vector<8x64xf32>
    %cst_25 = arith.constant 1.000000e+00 : f32
    %43 = vector.broadcast %cst_25 : f32 to vector<8x64xf32>
    %44 = arith.addf %43, %42 : vector<8x64xf32>
    %cst_26 = arith.constant 5.000000e-01 : f32
    %45 = vector.broadcast %cst_26 : f32 to vector<8x64xf32>
    %46 = arith.mulf %45, %44 : vector<8x64xf32>
    %47 = arith.mulf %34, %46 : vector<8x64xf32>
    %48 = arith.truncf %47 : vector<8x64xf32> to vector<8x64xbf16>
    %c0_27 = arith.constant 0 : index
    %c0_28 = arith.constant 0 : index
    %49 = vector.load %arg8[%c0_27, %c0_28] : memref<64x128xbf16, #tpu.memory_space<vmem>>, vector<64x128xbf16>
    %cst_29 = arith.constant dense<0.000000e+00> : vector<8x128xf32>
    %50 = tpu.matmul %48, %49, %cst_29 {dimension_numbers = #tpu.dot_dimension_numbers<[1], [0], [0], [1], [0, 0, 1, 1], [], []>} : vector<8x64xbf16>, vector<64x128xbf16>, vector<8x128xf32> -> vector<8x128xf32>
    %51 = arith.addf %29, %50 : vector<8x128xf32>
    %c0_30 = arith.constant 0 : index
    %c0_31 = arith.constant 0 : index
    %52 = vector.load %arg9[%c0_30, %c0_31] : memref<1x128xf32, #tpu.memory_space<vmem>>, vector<1x128xf32>
    %53 = vector.broadcast %52 : vector<1x128xf32> to vector<8x128xf32>
    %54 = arith.addf %51, %53 : vector<8x128xf32>
    %c0_32 = arith.constant 0 : index
    %c128 = arith.constant 128 : index
    %55 = vector.load %arg10[%c0_32, %c128] : memref<8x256xf32, #tpu.memory_space<vmem>>, vector<8x128xf32>
    tpu.vector_store %arg10[%c0_32, %c128], %54 {strides = array<i32>} : memref<8x256xf32, #tpu.memory_space<vmem>>, vector<8x128xf32>,
    return
  }
  func.func @transform_0(%arg0: i32) -> (i32, i32) {
    %c0_i32 = arith.constant 0 : i32
    %c0_i32_0 = arith.constant 0 : i32
    return %arg0, %c0_i32 : i32, i32
  }
  func.func @transform_1(%arg0: i32) -> (i32, i32) {
    %c0_i32 = arith.constant 0 : i32
    %c0_i32_0 = arith.constant 0 : i32
    %c0_i32_1 = arith.constant 0 : i32
    return %c0_i32, %c0_i32_0 : i32, i32
  }
  func.func @transform_2(%arg0: i32) -> (i32, i32) {
    %c0_i32 = arith.constant 0 : i32
    %c0_i32_0 = arith.constant 0 : i32
    %c0_i32_1 = arith.constant 0 : i32
    return %c0_i32, %c0_i32_0 : i32, i32
  }
  func.func @transform_3(%arg0: i32) -> (i32, i32) {
    %c0_i32 = arith.constant 0 : i32
    %c0_i32_0 = arith.constant 0 : i32
    %c0_i32_1 = arith.constant 0 : i32
    return %c0_i32, %c0_i32_0 : i32, i32
  }
  func.func @transform_4(%arg0: i32) -> (i32, i32) {
    %c0_i32 = arith.constant 0 : i32
    %c0_i32_0 = arith.constant 0 : i32
    %c0_i32_1 = arith.constant 0 : i32
    return %c0_i32, %c0_i32_0 : i32, i32
  }
  func.func @transform_5(%arg0: i32) -> (i32, i32) {
    %c0_i32 = arith.constant 0 : i32
    %c0_i32_0 = arith.constant 0 : i32
    %c0_i32_1 = arith.constant 0 : i32
    return %c0_i32, %c0_i32_0 : i32, i32
  }
  func.func @transform_6(%arg0: i32) -> (i32, i32) {
    %c0_i32 = arith.constant 0 : i32
    %c0_i32_0 = arith.constant 0 : i32
    %c0_i32_1 = arith.constant 0 : i32
    return %c0_i32, %c0_i32_0 : i32, i32
  }
  func.func @transform_7(%arg0: i32) -> (i32, i32) {
    %c0_i32 = arith.constant 0 : i32
    %c0_i32_0 = arith.constant 0 : i32
    %c0_i32_1 = arith.constant 0 : i32
    return %c0_i32, %c0_i32_0 : i32, i32
  }
  func.func @transform_8(%arg0: i32) -> (i32, i32) {
    %c0_i32 = arith.constant 0 : i32
    %c0_i32_0 = arith.constant 0 : i32
    %c0_i32_1 = arith.constant 0 : i32
    return %c0_i32, %c0_i32_0 : i32, i32
  }
  func.func @transform_9(%arg0: i32) -> (i32, i32) {
    %c0_i32 = arith.constant 0 : i32
    %c0_i32_0 = arith.constant 0 : i32
    return %arg0, %c0_i32 : i32, i32
  }
}

</mosaic_0001>

<bundles_post_ra>
// kernel: fwd_first.1
= control target key start
LH: loop header
LB: loop body
LE: loop exit
PB: predicated region body
PF: predicated region fallthrough
CT: control target
= control target key end

     0   :  { %14 = vsyncpa [#allocation3], 0  ;;  %s810_s0 = inlined_call_operand.vmem [shape: bf16[8,8], index: 0, kind: input, shape index: {}]   ;;  %s811_s1 = inlined_call_operand.hbm [shape: bf16[8,128], index: 1, kind: input, shape index: {}]   ;;  %s812_s2 = inlined_call_operand.hbm [shape: f32[1,128], index: 2, kind: input, shape index: {}]   ;;  %s813_s3 = inlined_call_operand.hbm [shape: bf16[128,128], index: 3, kind: input, shape index: {}]   ;;  %s814_s4 = inlined_call_operand.hbm [shape: f32[1,128], index: 4, kind: input, shape index: {}]   ;;  %s815_s5 = inlined_call_operand.vmem [shape: bf16[4,64], index: 5, kind: input, shape index: {}]   ;;  %s816_s6 = inlined_call_operand.hbm [shape: f32[1,64], index: 6, kind: input, shape index: {}]   ;;  %s817_s7 = inlined_call_operand.vmem [shape: bf16[64,128], index: 7, kind: input, shape index: {}]   ;;  %s818_s8 = inlined_call_operand.hbm [shape: f32[1,128], index: 8, kind: input, shape index: {}]   ;;  %s819_s9 = inlined_call_operand.vmem [shape: f32[8,256], index: 9, kind: output, shape index: {}]  }
   0x1   :  { %15 = vsyncpa [#allocation5], 0 }
   0x2   :  { %16 = vsyncpa [#allocation8], 0 }
   0x3   :  { %17 = vsyncpa [#allocation11], 0  ;;  %s685_s30 = smov [#allocation4]   ;;  %s686_s11 = smov [#allocation7]  }
   0x4   :  { %s36_s10 = sshll.u32 %s685_s30, 4  ;;  %s58_s12 = sshll.u32 %s686_s11, 4  ;;  %s37_s10 = int_to_ptr.vmem [resolvable:$true] %s36_s10  ;;  %s59_s12 = int_to_ptr.vmem [resolvable:$true] %s58_s12 }
   0x5   :  { %s565_s13 = scalar_lea.vmem %s37_s10, 16  ;;  %s569_s14 = scalar_lea.vmem %s37_s10, 32 }
   0x6   :  { %p566_p0 = scmp.ne.s32.totalorder %s37_s10, %s565_s13  ;;  %p570_p1 = scmp.lt.s32.totalorder %s37_s10, %s37_s10 }
   0x7   :  { %p571_p2 = scmp.lt.s32.totalorder %s569_s14, %s565_s13 }
   0x9   :  { %p572_p3 = por %p571_p2, %p570_p1 }
   0xb   :  { %p573_p4 = pnand %p572_p3, %p566_p0 }
   0xd   :  { %576 = shalt.err (!%p573_p4)
}
   0xe   :  { %39 = dma.hbm_to_vmem [thread:$0]  %s812_s2, 16, %s37_s10, [#allocation5]  }
   0xf   :  { %s585_s17 = scalar_lea.vmem %s59_s12, 16  ;;  %s589_s18 = scalar_lea.vmem %s59_s12, 32 }
  0x10   :  { %p586_p5 = scmp.ne.s32.totalorder %s59_s12, %s585_s17  ;;  %p590_p6 = scmp.lt.s32.totalorder %s59_s12, %s59_s12 }
  0x11   :  { %p591_p7 = scmp.lt.s32.totalorder %s589_s18, %s585_s17 }
  0x13   :  { %p592_p8 = por %p591_p7, %p590_p6 }
  0x15   :  { %p593_p9 = pnand %p592_p8, %p586_p5 }
  0x17   :  { %596 = shalt.err (!%p593_p9)
}
  0x18   :  { %61 = dma.hbm_to_vmem [thread:$0]  %s814_s4, 16, %s59_s12, [#allocation8]  }
  0x19   :  { %s687_s21 = smov [#allocation2]   ;;  %s688_s23 = smov [#allocation6]  }
  0x1a   :  { %s26_s22 = sshll.u32 %s687_s21, 4  ;;  %s45_s24 = sshll.u32 %s688_s23, 4  ;;  %s27_s22 = int_to_ptr.vmem [resolvable:$true] %s26_s22  ;;  %s46_s24 = int_to_ptr.vmem [resolvable:$true] %s45_s24 }
  0x1b   :  { %s605_s25 = scalar_lea.vmem %s27_s22, 64  ;;  %p610_p11 = scmp.lt.s32.totalorder %s27_s22, %s27_s22 }
  0x1c   :  { %p606_p10 = scmp.ne.s32.totalorder %s27_s22, %s605_s25  ;;  %p611_p12 = scmp.lt.s32.totalorder %s605_s25, %s605_s25 }
  0x1e   :  { %p612_p13 = por %p611_p12, %p610_p11 }
  0x20   :  { %p613_p0 = pnand %p612_p13, %p606_p10 }
  0x22   :  { %616 = shalt.err (!%p613_p0)
}
  0x23   :  { %29 = dma.hbm_to_vmem [thread:$0]  %s811_s1, 64, %s27_s22, [#allocation3]  }
  0x24   :  { %s625_s27 = scalar_lea.vmem %s46_s24, 1024  ;;  %p630_p2 = scmp.lt.s32.totalorder %s46_s24, %s46_s24 }
  0x25   :  { %p626_p1 = scmp.ne.s32.totalorder %s46_s24, %s625_s27  ;;  %p631_p3 = scmp.lt.s32.totalorder %s625_s27, %s625_s27 }
  0x27   :  { %p632_p4 = por %p631_p3, %p630_p2 }
  0x29   :  { %p633_p5 = pnand %p632_p4, %p626_p1 }
  0x2b   :  { %636 = shalt.err (!%p633_p5)
}
  0x2c   :  { %s689_s4 = smov 64   ;;  %s690_s28 = smov 4  }
  0x2d   :  { %51 = dma.hbm_to_vmem [thread:$0]  %s813_s3, 1024, %s46_s24, [#allocation5], %s689_s4, %s689_s4, %s690_s28  }
  0x2e   :  { %s691_s10 = smov [#allocation9]   ;;  %s692_s12 = smov [#allocation10]  }
  0x2f   :  { %s70_s11 = sshll.u32 %s691_s10, 4  ;;  %s82_s13 = sshll.u32 %s692_s12, 4  ;;  %s71_s11 = int_to_ptr.vmem [resolvable:$true] %s70_s11  ;;  %s83_s13 = int_to_ptr.vmem [resolvable:$true] %s82_s13 }
  0x30   :  { %s645_s1 = scalar_lea.vmem %s71_s11, 16  ;;  %s649_s14 = scalar_lea.vmem %s71_s11, 32 }
  0x31   :  { %p646_p6 = scmp.ne.s32.totalorder %s71_s11, %s645_s1  ;;  %p650_p7 = scmp.lt.s32.totalorder %s71_s11, %s71_s11 }
  0x32   :  { %p651_p8 = scmp.lt.s32.totalorder %s649_s14, %s645_s1 }
  0x34   :  { %p652_p9 = por %p651_p8, %p650_p7 }
  0x36   :  { %p653_p10 = pnand %p652_p9, %p646_p6 }
  0x38   :  { %656 = shalt.err (!%p653_p10)
}
  0x39   :  { %73 = dma.hbm_to_vmem [thread:$0]  %s816_s6, 16, %s71_s11, [#allocation8]  }
  0x3a   :  { %s665_s17 = scalar_lea.vmem %s83_s13, 16  ;;  %s669_s3 = scalar_lea.vmem %s83_s13, 32 }
  0x3b   :  { %p666_p11 = scmp.ne.s32.totalorder %s83_s13, %s665_s17  ;;  %p670_p12 = scmp.lt.s32.totalorder %s83_s13, %s83_s13 }
  0x3c   :  { %p671_p13 = scmp.lt.s32.totalorder %s669_s3, %s665_s17 }
  0x3e   :  { %p672_p0 = por %p671_p13, %p670_p12 }
  0x40   :  { %p673_p1 = pnand %p672_p0, %p666_p11 }
  0x42   :  { %676 = shalt.err (!%p673_p1)
}
  0x43   :  { %85 = dma.hbm_to_vmem [thread:$0]  %s818_s8, 16, %s83_s13, [#allocation11]  }
  0x44   :  { %677 = dma.done.wait [#allocation3], 64  }
  0x45   :  { %678 = vsyncadd [#allocation3], 4294967232 }
  0x46   :  { %679 = dma.done.wait [#allocation5], 1040  }
  0x47   :  { %680 = vsyncadd [#allocation5], 4294966256 }
  0x48   :  { %681 = dma.done.wait [#allocation8], 32  }
  0x49   :  { %682 = vsyncadd [#allocation8], 4294967264 }
  0x4a   :  { %683 = dma.done.wait [#allocation11], 16  }
  0x4b   :  { %684 = vsyncadd [#allocation11], 4294967280  ;;  %v693_v0 = vmov 0.0   ;;  %vm694_vm0 = vmmov 0   ;;  %vm118_vm1 = vcmask 1043456   ;;  %vm301_vm2 = vcmask 1041408  }
  0x4c   :  { %485 = vmatprep.subr.bf16.mxu0 %v693_v0  ;;  %487 = vmatprep.mubr.msk.bf16.mxu0 %vm694_vm0, %v693_v0  ;;  %v105_v1 = vld [vmem:[%s810_s0] sm:$0xf]  ;;  %vm114_vm3 = vcmask 64512   ;;  %s695_s22 = smov 124   ;;  %v542_v8 = vld [vmem:[#allocation6 + $0x30] sm:$0xff]   ;;  %v543_v9 = vld [vmem:[#allocation6 + $0x28] sm:$0xff]  }
  0x4d   :  { %491 = vmatprep.subr.bf16.mxu1 %v693_v0  ;;  %507 = vmatprep.mubr.msk.bf16.mxu1 %vm694_vm0, %v693_v0  ;;  %v106_v2 = vld [vmem:[#allocation2] sm:$0xf]  ;;  %v459_v4 = vcombine.low %v105_v1, %v105_v1  ;;  %v544_v10 = vld [vmem:[#allocation6 + $0x20] sm:$0xff]   ;;  %v546_v12 = vld [vmem:[#allocation6 + $0x10] sm:$0xff]   ;;  %vm297_vm4 = vcmask 31744   ;;  %vm394_vm5 = vcmask 523264  }
  0x4e   :  { %v284_v3 = vld [vmem:[%s815_s5] sm:$0x3]  ;;  %v120_v5 = vsel %vm118_vm1, %v106_v2, 0  ;;  %v547_v13 = vld [vmem:[#allocation6 + $0x8] sm:$0xff]   ;;  %v548_v14 = vld [vmem:[#allocation6] sm:$0xff]  }
  0x4f   :  { %v303_v6 = vsel %vm301_vm2, %v284_v3, 0  ;;  %486 = vmatpush3.bf16.msra.mxu0 %v120_v5  ;;  %295 = vrot.lane.b32.xlu0 %v459_v4, %s695_s22  ;;  %v541_v7 = vld [vmem:[#allocation6 + $0x38] sm:$0xff]   ;;  %v550_v26 = vld [vmem:[%s817_s7 + $0x10] sm:$0xff]   ;;  %v551_v29 = vld [vmem:[%s817_s7 + $0x8] sm:$0xff]  }
  0x50   :  { %511 = vmatprep.subr.bf16.mxu0 %v693_v0  ;;  %492 = vmatpush3.bf16.msra.mxu1 %v541_v7  ;;  %v545_v11 = vld [vmem:[#allocation6 + $0x18] sm:$0xff]   ;;  %v458_v36 = vld [vmem:[#allocation9] ss:$0 sm:$0xff]  ;;  %v449_v52 = vld [vmem:[#allocation7] ss:$0 sm:$0xff] }
  0x51   :  { %493 = vmatprep.subr.bf16.mxu1 %v693_v0  ;;  %v447_v16 = vld [vmem:[#allocation4] ss:$0 sm:$0xff]  ;;  %v549_v21 = vld [vmem:[%s817_s7 + $0x18] sm:$0xff]   ;;  %v461_v58 = vld [vmem:[#allocation10] ss:$0 sm:$0xff] }
  0x52   :  { %488 = vmatmul.mubr.msk.bf16.vlgmr.msra.gmra.mxu0 %vm114_vm3, %v105_v1  ;;  %v552_v30 = vld [vmem:[%s817_s7] sm:$0xff]  }
  0x53   :  { %512 = vmatpush3.bf16.msra.mxu0 %v303_v6  ;;  %513 = vmatprep.mubr.msk.bf16.mxu0 %vm694_vm0, %v693_v0 }
  0x54   :  { %517 = vmatprep.subr.bf16.mxu0 %v693_v0  ;;  %494 = vmatpush3.bf16.msra.mxu1 %v542_v8 }
  0x55   :  { %495 = vmatprep.subr.bf16.mxu1 %v693_v0 }
  0x58   :  { %496 = vmatpush3.bf16.msra.mxu1 %v543_v9 }
  0x59   :  { %497 = vmatprep.subr.bf16.mxu1 %v693_v0 }
  0x5c   :  { %498 = vmatpush3.bf16.msra.mxu1 %v544_v10 }
  0x5d   :  { %499 = vmatprep.subr.bf16.mxu1 %v693_v0 }
  0x60   :  { %500 = vmatpush3.bf16.msra.mxu1 %v545_v11 }
  0x61   :  { %501 = vmatprep.subr.bf16.mxu1 %v693_v0 }
  0x64   :  { %502 = vmatpush3.bf16.msra.mxu1 %v546_v12 }
  0x65   :  { %503 = vmatprep.subr.bf16.mxu1 %v693_v0 }
  0x68   :  { %504 = vmatpush3.bf16.msra.mxu1 %v547_v13 }
  0x69   :  { %505 = vmatprep.subr.bf16.mxu1 %v693_v0 }
  0x6c   :  { %506 = vmatpush3.bf16.msra.mxu1 %v548_v14 }
  0xc1   :  { %v296_v15 = vpop.permute.xlu0 %295 }
  0xc2   :  { %514 = vmatmul.mubr.msk.bf16.vlgmr.msra.gmra.mxu0 %vm297_vm4, %v296_v15 }
  0xc3   :  { %525 = vmatprep.mubr.msk.bf16.mxu0 %vm694_vm0, %v693_v0  ;;  %518 = vmatpush3.bf16.msra.mxu0 %v549_v21 }
  0xc4   :  { %519 = vmatprep.subr.bf16.mxu0 %v693_v0 }
  0xc7   :  { %520 = vmatpush3.bf16.msra.mxu0 %v550_v26 }
  0xc8   :  { %521 = vmatprep.subr.bf16.mxu0 %v693_v0 }
  0xcb   :  { %522 = vmatpush3.bf16.msra.mxu0 %v551_v29 }
  0xcc   :  { %523 = vmatprep.subr.bf16.mxu0 %v693_v0 }
  0xcf   :  { %524 = vmatpush3.bf16.msra.mxu0 %v552_v30 }
 0x112   :  { %v156_v17 = vpop.f32.mrf.mxu0 }
 0x113   :  { %v157_v18 = vadd.f32 %v447_v16, %v156_v17 }
 0x114   :  { %v489_v19 = vpop.f32.mrf.mxu0 }
 0x115   :  { %v162_v20 = vmul.f32 %v157_v18, %v157_v18 }
 0x116   :  { %v159_v22 = vpop.f32.mrf.mxu0 }
 0x117   :  { %v163_v23 = vmul.f32 %v162_v20, %v157_v18 }
 0x118   :  { %v490_v24 = vpop.f32.mrf.mxu0 }
 0x119   :  { %v164_v25 = vmul.f32 0.044715, %v163_v23 }
 0x11b   :  { %v165_v27 = vadd.f32 %v164_v25, %v157_v18 }
 0x11d   :  { %v166_v28 = vmul.f32 0.7978846, %v165_v27 }
 0x11f   :  { %553 = vtanh.f32 %v166_v28 }
 0x12c   :  { %v554_v31 = vpop.eup %553 }
 0x12d   :  { %v168_v32 = vadd.f32 1.0, %v554_v31 }
 0x12f   :  { %v169_v33 = vmul.f32 0.5, %v168_v32 }
 0x131   :  { %v170_v34 = vmul.f32 %v169_v33, %v157_v18 }
 0x133   :  { %v171_v35 = vpack.c.bf16 %v170_v34, %v170_v34 }
 0x135   :  { %508 = vmatmul.mubr.bf16.vlgmr.msra.gmra.mxu1 %v171_v35 }
 0x182   :  { %v339_v37 = vpop.f32.mrf.mxu0 }
 0x183   :  { %v340_v38 = vadd.f32 %v458_v36, %v339_v37 }
 0x184   :  { %v515_v39 = vpop.f32.mrf.mxu0 }
 0x185   :  { %v345_v40 = vmul.f32 %v340_v38, %v340_v38 }
 0x186   :  { %v342_v41 = vpop.f32.mrf.mxu0 }
 0x187   :  { %v346_v42 = vmul.f32 %v345_v40, %v340_v38 }
 0x188   :  { %v516_v43 = vpop.f32.mrf.mxu0 }
 0x189   :  { %v347_v44 = vmul.f32 0.044715, %v346_v42 }
 0x18b   :  { %v348_v45 = vadd.f32 %v347_v44, %v340_v38 }
 0x18d   :  { %v349_v46 = vmul.f32 0.7978846, %v348_v45 }
 0x18f   :  { %555 = vtanh.f32 %v349_v46 }
 0x19c   :  { %v556_v47 = vpop.eup %555 }
 0x19d   :  { %v351_v48 = vadd.f32 1.0, %v556_v47 }
 0x19f   :  { %v352_v49 = vmul.f32 0.5, %v351_v48 }
 0x1a1   :  { %v353_v50 = vmul.f32 %v352_v49, %v340_v38 }
 0x1a3   :  { %v354_v51 = vpack.c.bf16 %v353_v50, %v353_v50 }
 0x1a5   :  { %526 = vmatmul.mubr.msk.bf16.vlgmr.msra.gmra.mxu0 %vm394_vm5, %v354_v51 }
 0x1f5   :  { %v277_v53 = vpop.f32.mrf.mxu1 }
 0x1f6   :  { %v278_v54 = vadd.f32 %v449_v52, %v277_v53 }
 0x1f7   :  { %v509_v55 = vpop.f32.mrf.mxu1 }
 0x1f8   :  { %283 = vst [vmem:[%s819_s9] sm:$0xff] %v278_v54 }
 0x1f9   :  { %v280_v56 = vpop.f32.mrf.mxu1 }
 0x1fb   :  { %v510_v57 = vpop.f32.mrf.mxu1 }
 0x265   :  { %v432_v59 = vpop.f32.mrf.mxu0 }
 0x266   :  { %v433_v60 = vadd.f32 %v461_v58, %v432_v59 }
 0x267   :  { %v527_v61 = vpop.f32.mrf.mxu0 }
 0x268   :  { %438 = vst [vmem:[%s819_s9 + $0x8] sm:$0xff] %v433_v60 }
 0x269   :  { %v435_v62 = vpop.f32.mrf.mxu0 }
 0x26b   :  { %v528_v63 = vpop.f32.mrf.mxu0 }
 0x26c   :  { %443 = vsyncpa [#allocation3], 1 }
 0x26d   :  { %444 = vsyncpa [#allocation5], 1 }
 0x26e   :  { %445 = vsyncpa [#allocation8], 1 }
 0x26f   :  { %446 = vsyncpa [#allocation11], 1 }

</bundles_post_ra>
